<compile_context>
chip_gen: v7x
topology: tpu7x:2x2x1
jax: 0.10.0
libtpu: 0.0.40
codegen_flags: <defaults>
</compile_context>

<pallas_src>
import functools

import jax
import jax.numpy as jnp
from jax import lax
from jax.experimental import pallas as pl
from jax.experimental.pallas import tpu as pltpu

_LANES = 128
_PALLAS_MIN_BATCH = 2048       # below this, plain XLA fusion beats kernel overhead
_MIN_BATCH_FOR_TWO_TILES = 16384   # force >=2 grid tiles (v7x 2-TC sharding)


def _round_up(x, m):
    return ((x + m - 1) // m) * m


def _max_block_rows():
    """Largest batch-rows-per-tile that is VMEM-safe on the local chip."""
    try:
        kind = jax.devices()[0].device_kind.lower()
    except Exception:
        return 512
    # v5e: 16 MiB default scoped VMEM -> 512 rows (7.3 MiB double-buffered).
    # v6e/v7x: 32 MiB scoped -> 1024 rows (14.7 MiB double-buffered) to
    # amortize the ~0.35 us per-grid-step pipeline overhead.
    if "v5" in kind:
        return 512
    return 1024


def _quaternion_loss_kernel(q_ref, w_ref, b_ref, t_ref, out_ref, *, dt,
                            disturbance, batch, block_rows):
    """q_ref:(4,R,128) w_ref:(3,R,128) b_ref:(3,R,128) t_ref:(4,R,128) f32 VMEM.

    out_ref: (1, 128) f32 VMEM — lane-dense partial sums for this tile.
    """
    tiny = jnp.float32(1e-30)

    # --- corrected angular velocity (disturbance==0 specialized away) -------
    wx = w_ref[0] - b_ref[0]
    wy = w_ref[1] - b_ref[1]
    wz = w_ref[2] - b_ref[2]
    if disturbance != 0.0:
        dist = jnp.float32(disturbance)
        wx, wy, wz = wx - dist, wy - dist, wz - dist

    # --- rotation correction from corrected angular velocity ----------------
    w2 = wx * wx + wy * wy + wz * wz
    inv_wn = lax.rsqrt(jnp.maximum(w2, tiny))      # guarded: w -> 0 is safe
    wn = w2 * inv_wn                               # |w|
    half = (0.5 * dt) * wn
    rw = jnp.cos(half)
    s = jnp.sin(half) * inv_wn
    rx, ry, rz = s * wx, s * wy, s * wz
    # NOTE: (rw,rx,ry,rz) is algebraically unit-norm; the reference's extra
    # renormalization is an exact no-op and is dropped (saves ~12 VALU + rsqrt).

    # --- normalize initial quaternion ----------------------------------------
    qw, qx, qy, qz = q_ref[0], q_ref[1], q_ref[2], q_ref[3]
    inv_qn = lax.rsqrt(jnp.maximum(qw * qw + qx * qx + qy * qy + qz * qz, tiny))
    qw, qx, qy, qz = qw * inv_qn, qx * inv_qn, qy * inv_qn, qz * inv_qn

    # --- computed = q_init * rotation_correction (Hamilton product) ----------
    cw = qw * rw - qx * rx - qy * ry - qz * rz
    cx = qw * rx + qx * rw + qy * rz - qz * ry
    cy = qw * ry - qx * rz + qy * rw + qz * rx
    cz = qw * rz + qx * ry - qy * rx + qz * rw

    # --- rotation_diff = conj(computed) * true_quaternion --------------------
    # Conjugation folded into the product's signs (no materialized negation).
    # true_q loaded late to shorten live ranges / vreg pressure.
    tw, tx, ty, tz = t_ref[0], t_ref[1], t_ref[2], t_ref[3]
    dw = cw * tw + cx * tx + cy * ty + cz * tz
    dx = cw * tx - cx * tw - cy * tz + cz * ty
    dy = cw * ty + cx * tz - cy * tw - cz * tx
    dz = cw * tz - cx * ty + cy * tx - cz * tw

    # --- quaternion log (faithful: d is renormalized like the reference) -----
    v2 = dx * dx + dy * dy + dz * dz
    d2 = dw * dw + v2
    inv_dn = lax.rsqrt(jnp.maximum(d2, tiny))
    dwn = dw * inv_dn
    v2n = v2 * (inv_dn * inv_dn)                   # |v|^2 after normalizing d
    v2c = jnp.maximum(v2n, jnp.float32(1e-12))
    inv_vn = lax.rsqrt(v2c)
    vn = v2c * inv_vn                              # == max(|v_n|, 1e-6)
    angle = 2.0 * jnp.arctan2(vn, dwn)
    scale = (angle * inv_vn) * inv_dn              # applied to UN-normalized d_xyz
    lx, ly, lz = scale * dx, scale * dy, scale * dz

    # --- Huber(delta=1) against zeros -----------------------------------------
    def huber(u):
        au = jnp.abs(u)
        return jnp.where(au < 1.0, 0.5 * u * u, au - 0.5)

    per = huber(lx) + huber(ly) + huber(lz)        # (block_rows, 128)

    pid = pl.program_id(0)
    is_last = pid == pl.num_programs(0) - 1

    @pl.when(jnp.logical_not(is_last))
    def _():
        # interior tiles are always fully valid -> no masking cost
        out_ref[...] = jnp.sum(per, axis=0, keepdims=True)

    @pl.when(is_last)
    def _():
        # mask padded lanes on the last tile only
        row = lax.broadcasted_iota(jnp.int32, (block_rows, _LANES), 0)
        lane = lax.broadcasted_iota(jnp.int32, (block_rows, _LANES), 1)
        rem = batch - pid * (block_rows * _LANES)
        masked = jnp.where(row * _LANES + lane < rem, per, jnp.float32(0.0))
        out_ref[...] = jnp.sum(masked, axis=0, keepdims=True)


def _quaternion_loss_jax(init_q, ang, bias, true_q, dt, disturbance):
    """Pure-JAX reference path (matches the PyTorch module exactly)."""
    wc = ang - bias - disturbance
    wn = jnp.linalg.norm(wc, axis=-1, keepdims=True)
    half = 0.5 * wn * dt
    rot = jnp.concatenate([jnp.cos(half), jnp.sin(half) * wc / wn], axis=-1)
    rot = rot / jnp.linalg.norm(rot, axis=-1, keepdims=True)
    q0 = init_q / jnp.linalg.norm(init_q, axis=-1, keepdims=True)

    def qmul(a, b):
        w0, x0, y0, z0 = jnp.moveaxis(a, -1, 0)
        w1, x1, y1, z1 = jnp.moveaxis(b, -1, 0)
        return jnp.stack([w0 * w1 - x0 * x1 - y0 * y1 - z0 * z1,
                          w0 * x1 + x0 * w1 + y0 * z1 - z0 * y1,
                          w0 * y1 - x0 * z1 + y0 * w1 + z0 * x1,
                          w0 * z1 + x0 * y1 - y0 * x1 + z0 * w1], axis=-1)

    comp = qmul(q0, rot)
    conj = comp * jnp.array([1.0, -1.0, -1.0, -1.0], jnp.float32)
    d = qmul(conj, true_q)
    d = d / jnp.linalg.norm(d, axis=-1, keepdims=True)
    v = d[..., 1:]
    vn = jnp.linalg.norm(v, axis=-1, keepdims=True)
    vn = jnp.where(vn > 1e-6, vn, 1e-6)
    angle = 2.0 * jnp.arctan2(vn, d[..., :1])
    logd = angle * v / vn
    au = jnp.abs(logd)
    h = jnp.where(au < 1.0, 0.5 * logd * logd, au - 0.5)
    return jnp.mean(h)


def _gather_inputs(true_quaternions, predicted_biases, batch_X,
                   quaternions_all, indices, sequence_length):
    # data-dependent per-sample gather + slice: tiny, done as plain-JAX glue.
    init_idx = jnp.maximum(indices - (sequence_length - 1), 0)
    init_q = jnp.take(quaternions_all, init_idx, axis=0).astype(jnp.float32)
    ang = batch_X[:, -1, 3:6].astype(jnp.float32)
    bias = predicted_biases.astype(jnp.float32)
    true_q = true_quaternions.astype(jnp.float32)
    return init_q, ang, bias, true_q


def custom_quaternion_loss(true_quaternions, predicted_biases, batch_X,
                           quaternions_all, indices, sequence_length,
                           dt=0.01, disturbance=0.0, *,
                           force_pallas=False, block_rows=None):
    """JAX/Pallas equivalent of CustomQuaternionLoss.forward."""
    B = true_quaternions.shape[0]
    if B == 0:
        return jnp.float32(0.0)

    init_q, ang, bias, true_q = _gather_inputs(
        true_quaternions, predicted_biases, batch_X, quaternions_all, indices,
        sequence_length)

    if B < _PALLAS_MIN_BATCH and not force_pallas:
        # Tiny batch: fixed pallas_call/DMA overhead dwarfs the math.
        return _quaternion_loss_jax(init_q, ang, bias, true_q, dt, disturbance)

    rows_needed = pl.cdiv(B, _LANES)
    if block_rows is None:
        max_rows = _max_block_rows()
        num_tiles = pl.cdiv(rows_needed, max_rows)
        if B >= _MIN_BATCH_FOR_TWO_TILES:
            # give v7x's two TensorCores at least one tile each
            num_tiles = max(num_tiles, 2)
        block_rows = max(8, _round_up(pl.cdiv(rows_needed, num_tiles), 8))
    assert block_rows % 8 == 0 and block_rows > 0
    num_tiles = pl.cdiv(rows_needed, block_rows)
    b_pad = num_tiles * block_rows * _LANES

    # One fused transpose+pad+reshape per input -> component-major slab.
    # (No concatenate: each array is relaid out exactly once.)
    def to_slab(x):
        c = x.shape[1]
        xt = jnp.pad(x.T, ((0, 0), (0, b_pad - B)))
        return xt.reshape(c, b_pad // _LANES, _LANES)

    q_slab, w_slab, b_slab, t_slab = (to_slab(init_q), to_slab(ang),
                                      to_slab(bias), to_slab(true_q))

    kernel = functools.partial(_quaternion_loss_kernel,
                               dt=float(dt), disturbance=float(disturbance),
                               batch=B, block_rows=block_rows)
    partial_sums = pl.pallas_call(
        kernel,
        out_shape=jax.ShapeDtypeStruct((num_tiles, _LANES), jnp.float32),
        grid=(num_tiles,),
        in_specs=[pl.BlockSpec((4, block_rows, _LANES), lambda i: (0, i, 0)),
                  pl.BlockSpec((3, block_rows, _LANES), lambda i: (0, i, 0)),
                  pl.BlockSpec((3, block_rows, _LANES), lambda i: (0, i, 0)),
                  pl.BlockSpec((4, block_rows, _LANES), lambda i: (0, i, 0))],
        out_specs=pl.BlockSpec((1, _LANES), lambda i: (i, 0)),
        compiler_params=pltpu.CompilerParams(
            dimension_semantics=("parallel",)),
    )(q_slab, w_slab, b_slab, t_slab)
    return jnp.sum(partial_sums) * (1.0 / (3.0 * B))


def _reference_loss(true_quaternions, predicted_biases, batch_X,
                    quaternions_all, indices, sequence_length,
                    dt=0.01, disturbance=0.0):
    init_q, ang, bias, true_q = _gather_inputs(
        true_quaternions, predicted_biases, batch_X, quaternions_all, indices,
        sequence_length)
    return _quaternion_loss_jax(init_q, ang, bias, true_q, dt, disturbance)


if __name__ == "__main__":
    sequence_length = 10
    dt = 0.01

    def make_case(key, B, N=64, S=10, F=6):
        k1, k2, k3, k4, k5 = jax.random.split(key, 5)
        true_q = jax.random.normal(k1, (B, 4), jnp.float32)
        true_q = true_q / jnp.linalg.norm(true_q, axis=-1, keepdims=True)
        biases = 0.05 * jax.random.normal(k2, (B, 3), jnp.float32)
        batch_X = jax.random.normal(k3, (B, S, F), jnp.float32)
        quats = jax.random.normal(k4, (N, 4), jnp.float32)
        quats = quats / jnp.linalg.norm(quats, axis=-1, keepdims=True)
        idx = jax.random.randint(k5, (B,), 0, N)
        return true_q, biases, batch_X, quats, idx

    key = jax.random.PRNGKey(0)
    k_a, k_b = jax.random.split(key)

    # Case 1: module-scale tiny batch; force the Pallas path so the kernel runs.
    args = make_case(k_a, 8)
    loss = custom_quaternion_loss(*args, sequence_length, dt=dt,
                                  disturbance=0.0, force_pallas=True)
    loss = jax.block_until_ready(loss)
    ref = _reference_loss(*args, sequence_length, dt=dt, disturbance=0.0)
    assert jnp.allclose(loss, ref, atol=1e-3, rtol=1e-3), (loss, ref)

    # Case 2: batch spanning multiple grid tiles (masking on last tile + grid
    # sharding exercised).
    args2 = make_case(k_b, 1500)
    loss2 = custom_quaternion_loss(*args2, sequence_length, dt=dt,
                                   disturbance=0.0, force_pallas=True,
                                   block_rows=8)   # 8*128=1024 samples/tile -> 2 tiles
    loss2 = jax.block_until_ready(loss2)
    ref2 = _reference_loss(*args2, sequence_length, dt=dt, disturbance=0.0)
    assert jnp.allclose(loss2, ref2, atol=1e-3, rtol=1e-3), (loss2, ref2)

    print("KERNEL_OK")
</pallas_src>

<mosaic_0001>
module attributes {stable_mosaic.version = 11 : i64} {
  func.func @_quaternion_loss_kernel(%arg0: i32, %arg1: memref<4x8x128xf32, #tpu.memory_space<vmem>>, %arg2: memref<3x8x128xf32, #tpu.memory_space<vmem>>, %arg3: memref<3x8x128xf32, #tpu.memory_space<vmem>>, %arg4: memref<4x8x128xf32, #tpu.memory_space<vmem>>, %arg5: memref<1x128xf32, #tpu.memory_space<vmem>>) attributes {dimension_semantics = [#tpu.dimension_semantics<parallel>], iteration_bounds = array<i64: 1>, scalar_prefetch = 0 : i64, scratch_operands = 0 : i64, tpu.core_type = #tpu.core_type<tc>, window_params = [{transform_indices = @transform_0, window_bounds = array<i64: 4, 8, 128>}, {transform_indices = @transform_1, window_bounds = array<i64: 3, 8, 128>}, {transform_indices = @transform_2, window_bounds = array<i64: 3, 8, 128>}, {transform_indices = @transform_3, window_bounds = array<i64: 4, 8, 128>}, {transform_indices = @transform_4, window_bounds = array<i64: 1, 128>}]} {
    %c0 = arith.constant 0 : index
    %c0_0 = arith.constant 0 : index
    %c0_1 = arith.constant 0 : index
    %0 = vector.load %arg2[%c0, %c0_0, %c0_1] : memref<3x8x128xf32, #tpu.memory_space<vmem>>, vector<1x8x128xf32>
    %1 = vector.shape_cast %0 : vector<1x8x128xf32> to vector<8x128xf32>
    %c0_2 = arith.constant 0 : index
    %c0_3 = arith.constant 0 : index
    %c0_4 = arith.constant 0 : index
    %2 = vector.load %arg3[%c0_2, %c0_3, %c0_4] : memref<3x8x128xf32, #tpu.memory_space<vmem>>, vector<1x8x128xf32>
    %3 = vector.shape_cast %2 : vector<1x8x128xf32> to vector<8x128xf32>
    %4 = arith.subf %1, %3 : vector<8x128xf32>
    %c1 = arith.constant 1 : index
    %c0_5 = arith.constant 0 : index
    %c0_6 = arith.constant 0 : index
    %5 = vector.load %arg2[%c1, %c0_5, %c0_6] : memref<3x8x128xf32, #tpu.memory_space<vmem>>, vector<1x8x128xf32>
    %6 = vector.shape_cast %5 : vector<1x8x128xf32> to vector<8x128xf32>
    %c1_7 = arith.constant 1 : index
    %c0_8 = arith.constant 0 : index
    %c0_9 = arith.constant 0 : index
    %7 = vector.load %arg3[%c1_7, %c0_8, %c0_9] : memref<3x8x128xf32, #tpu.memory_space<vmem>>, vector<1x8x128xf32>
    %8 = vector.shape_cast %7 : vector<1x8x128xf32> to vector<8x128xf32>
    %9 = arith.subf %6, %8 : vector<8x128xf32>
    %c2 = arith.constant 2 : index
    %c0_10 = arith.constant 0 : index
    %c0_11 = arith.constant 0 : index
    %10 = vector.load %arg2[%c2, %c0_10, %c0_11] : memref<3x8x128xf32, #tpu.memory_space<vmem>>, vector<1x8x128xf32>
    %11 = vector.shape_cast %10 : vector<1x8x128xf32> to vector<8x128xf32>
    %c2_12 = arith.constant 2 : index
    %c0_13 = arith.constant 0 : index
    %c0_14 = arith.constant 0 : index
    %12 = vector.load %arg3[%c2_12, %c0_13, %c0_14] : memref<3x8x128xf32, #tpu.memory_space<vmem>>, vector<1x8x128xf32>
    %13 = vector.shape_cast %12 : vector<1x8x128xf32> to vector<8x128xf32>
    %14 = arith.subf %11, %13 : vector<8x128xf32>
    %15 = arith.mulf %4, %4 : vector<8x128xf32>
    %16 = arith.mulf %9, %9 : vector<8x128xf32>
    %17 = arith.addf %15, %16 : vector<8x128xf32>
    %18 = arith.mulf %14, %14 : vector<8x128xf32>
    %19 = arith.addf %17, %18 : vector<8x128xf32>
    %cst = arith.constant 1.000000e-30 : f32
    %20 = vector.broadcast %cst : f32 to vector<8x128xf32>
    %21 = arith.maximumf %19, %20 : vector<8x128xf32>
    %22 = math.rsqrt %21 : vector<8x128xf32>
    %23 = arith.mulf %19, %22 : vector<8x128xf32>
    %cst_15 = arith.constant 5.000000e-03 : f32
    %24 = vector.broadcast %cst_15 : f32 to vector<8x128xf32>
    %25 = arith.mulf %24, %23 : vector<8x128xf32>
    %26 = math.cos %25 : vector<8x128xf32>
    %27 = math.sin %25 : vector<8x128xf32>
    %28 = arith.mulf %27, %22 : vector<8x128xf32>
    %29 = arith.mulf %28, %4 : vector<8x128xf32>
    %30 = arith.mulf %28, %9 : vector<8x128xf32>
    %31 = arith.mulf %28, %14 : vector<8x128xf32>
    %c0_16 = arith.constant 0 : index
    %c0_17 = arith.constant 0 : index
    %c0_18 = arith.constant 0 : index
    %32 = vector.load %arg1[%c0_16, %c0_17, %c0_18] : memref<4x8x128xf32, #tpu.memory_space<vmem>>, vector<1x8x128xf32>
    %33 = vector.shape_cast %32 : vector<1x8x128xf32> to vector<8x128xf32>
    %c1_19 = arith.constant 1 : index
    %c0_20 = arith.constant 0 : index
    %c0_21 = arith.constant 0 : index
    %34 = vector.load %arg1[%c1_19, %c0_20, %c0_21] : memref<4x8x128xf32, #tpu.memory_space<vmem>>, vector<1x8x128xf32>
    %35 = vector.shape_cast %34 : vector<1x8x128xf32> to vector<8x128xf32>
    %c2_22 = arith.constant 2 : index
    %c0_23 = arith.constant 0 : index
    %c0_24 = arith.constant 0 : index
    %36 = vector.load %arg1[%c2_22, %c0_23, %c0_24] : memref<4x8x128xf32, #tpu.memory_space<vmem>>, vector<1x8x128xf32>
    %37 = vector.shape_cast %36 : vector<1x8x128xf32> to vector<8x128xf32>
    %c3 = arith.constant 3 : index
    %c0_25 = arith.constant 0 : index
    %c0_26 = arith.constant 0 : index
    %38 = vector.load %arg1[%c3, %c0_25, %c0_26] : memref<4x8x128xf32, #tpu.memory_space<vmem>>, vector<1x8x128xf32>
    %39 = vector.shape_cast %38 : vector<1x8x128xf32> to vector<8x128xf32>
    %40 = arith.mulf %33, %33 : vector<8x128xf32>
    %41 = arith.mulf %35, %35 : vector<8x128xf32>
    %42 = arith.addf %40, %41 : vector<8x128xf32>
    %43 = arith.mulf %37, %37 : vector<8x128xf32>
    %44 = arith.addf %42, %43 : vector<8x128xf32>
    %45 = arith.mulf %39, %39 : vector<8x128xf32>
    %46 = arith.addf %44, %45 : vector<8x128xf32>
    %cst_27 = arith.constant 1.000000e-30 : f32
    %47 = vector.broadcast %cst_27 : f32 to vector<8x128xf32>
    %48 = arith.maximumf %46, %47 : vector<8x128xf32>
    %49 = math.rsqrt %48 : vector<8x128xf32>
    %50 = arith.mulf %33, %49 : vector<8x128xf32>
    %51 = arith.mulf %35, %49 : vector<8x128xf32>
    %52 = arith.mulf %37, %49 : vector<8x128xf32>
    %53 = arith.mulf %39, %49 : vector<8x128xf32>
    %54 = arith.mulf %50, %26 : vector<8x128xf32>
    %55 = arith.mulf %51, %29 : vector<8x128xf32>
    %56 = arith.subf %54, %55 : vector<8x128xf32>
    %57 = arith.mulf %52, %30 : vector<8x128xf32>
    %58 = arith.subf %56, %57 : vector<8x128xf32>
    %59 = arith.mulf %53, %31 : vector<8x128xf32>
    %60 = arith.subf %58, %59 : vector<8x128xf32>
    %61 = arith.mulf %50, %29 : vector<8x128xf32>
    %62 = arith.mulf %51, %26 : vector<8x128xf32>
    %63 = arith.addf %61, %62 : vector<8x128xf32>
    %64 = arith.mulf %52, %31 : vector<8x128xf32>
    %65 = arith.addf %63, %64 : vector<8x128xf32>
    %66 = arith.mulf %53, %30 : vector<8x128xf32>
    %67 = arith.subf %65, %66 : vector<8x128xf32>
    %68 = arith.mulf %50, %30 : vector<8x128xf32>
    %69 = arith.mulf %51, %31 : vector<8x128xf32>
    %70 = arith.subf %68, %69 : vector<8x128xf32>
    %71 = arith.mulf %52, %26 : vector<8x128xf32>
    %72 = arith.addf %70, %71 : vector<8x128xf32>
    %73 = arith.mulf %53, %29 : vector<8x128xf32>
    %74 = arith.addf %72, %73 : vector<8x128xf32>
    %75 = arith.mulf %50, %31 : vector<8x128xf32>
    %76 = arith.mulf %51, %30 : vector<8x128xf32>
    %77 = arith.addf %75, %76 : vector<8x128xf32>
    %78 = arith.mulf %52, %29 : vector<8x128xf32>
    %79 = arith.subf %77, %78 : vector<8x128xf32>
    %80 = arith.mulf %53, %26 : vector<8x128xf32>
    %81 = arith.addf %79, %80 : vector<8x128xf32>
    %c0_28 = arith.constant 0 : index
    %c0_29 = arith.constant 0 : index
    %c0_30 = arith.constant 0 : index
    %82 = vector.load %arg4[%c0_28, %c0_29, %c0_30] : memref<4x8x128xf32, #tpu.memory_space<vmem>>, vector<1x8x128xf32>
    %83 = vector.shape_cast %82 : vector<1x8x128xf32> to vector<8x128xf32>
    %c1_31 = arith.constant 1 : index
    %c0_32 = arith.constant 0 : index
    %c0_33 = arith.constant 0 : index
    %84 = vector.load %arg4[%c1_31, %c0_32, %c0_33] : memref<4x8x128xf32, #tpu.memory_space<vmem>>, vector<1x8x128xf32>
    %85 = vector.shape_cast %84 : vector<1x8x128xf32> to vector<8x128xf32>
    %c2_34 = arith.constant 2 : index
    %c0_35 = arith.constant 0 : index
    %c0_36 = arith.constant 0 : index
    %86 = vector.load %arg4[%c2_34, %c0_35, %c0_36] : memref<4x8x128xf32, #tpu.memory_space<vmem>>, vector<1x8x128xf32>
    %87 = vector.shape_cast %86 : vector<1x8x128xf32> to vector<8x128xf32>
    %c3_37 = arith.constant 3 : index
    %c0_38 = arith.constant 0 : index
    %c0_39 = arith.constant 0 : index
    %88 = vector.load %arg4[%c3_37, %c0_38, %c0_39] : memref<4x8x128xf32, #tpu.memory_space<vmem>>, vector<1x8x128xf32>
    %89 = vector.shape_cast %88 : vector<1x8x128xf32> to vector<8x128xf32>
    %90 = arith.mulf %60, %83 : vector<8x128xf32>
    %91 = arith.mulf %67, %85 : vector<8x128xf32>
    %92 = arith.addf %90, %91 : vector<8x128xf32>
    %93 = arith.mulf %74, %87 : vector<8x128xf32>
    %94 = arith.addf %92, %93 : vector<8x128xf32>
    %95 = arith.mulf %81, %89 : vector<8x128xf32>
    %96 = arith.addf %94, %95 : vector<8x128xf32>
    %97 = arith.mulf %60, %85 : vector<8x128xf32>
    %98 = arith.mulf %67, %83 : vector<8x128xf32>
    %99 = arith.subf %97, %98 : vector<8x128xf32>
    %100 = arith.mulf %74, %89 : vector<8x128xf32>
    %101 = arith.subf %99, %100 : vector<8x128xf32>
    %102 = arith.mulf %81, %87 : vector<8x128xf32>
    %103 = arith.addf %101, %102 : vector<8x128xf32>
    %104 = arith.mulf %60, %87 : vector<8x128xf32>
    %105 = arith.mulf %67, %89 : vector<8x128xf32>
    %106 = arith.addf %104, %105 : vector<8x128xf32>
    %107 = arith.mulf %74, %83 : vector<8x128xf32>
    %108 = arith.subf %106, %107 : vector<8x128xf32>
    %109 = arith.mulf %81, %85 : vector<8x128xf32>
    %110 = arith.subf %108, %109 : vector<8x128xf32>
    %111 = arith.mulf %60, %89 : vector<8x128xf32>
    %112 = arith.mulf %67, %87 : vector<8x128xf32>
    %113 = arith.subf %111, %112 : vector<8x128xf32>
    %114 = arith.mulf %74, %85 : vector<8x128xf32>
    %115 = arith.addf %113, %114 : vector<8x128xf32>
    %116 = arith.mulf %81, %83 : vector<8x128xf32>
    %117 = arith.subf %115, %116 : vector<8x128xf32>
    %118 = arith.mulf %103, %103 : vector<8x128xf32>
    %119 = arith.mulf %110, %110 : vector<8x128xf32>
    %120 = arith.addf %118, %119 : vector<8x128xf32>
    %121 = arith.mulf %117, %117 : vector<8x128xf32>
    %122 = arith.addf %120, %121 : vector<8x128xf32>
    %123 = arith.mulf %96, %96 : vector<8x128xf32>
    %124 = arith.addf %123, %122 : vector<8x128xf32>
    %cst_40 = arith.constant 1.000000e-30 : f32
    %125 = vector.broadcast %cst_40 : f32 to vector<8x128xf32>
    %126 = arith.maximumf %124, %125 : vector<8x128xf32>
    %127 = math.rsqrt %126 : vector<8x128xf32>
    %128 = arith.mulf %96, %127 : vector<8x128xf32>
    %129 = arith.mulf %127, %127 : vector<8x128xf32>
    %130 = arith.mulf %122, %129 : vector<8x128xf32>
    %cst_41 = arith.constant 9.99999996E-13 : f32
    %131 = vector.broadcast %cst_41 : f32 to vector<8x128xf32>
    %132 = arith.maximumf %130, %131 : vector<8x128xf32>
    %133 = math.rsqrt %132 : vector<8x128xf32>
    %134 = arith.mulf %132, %133 : vector<8x128xf32>
    %135 = math.atan2 %134, %128 : vector<8x128xf32>
    %cst_42 = arith.constant 2.000000e+00 : f32
    %136 = vector.broadcast %cst_42 : f32 to vector<8x128xf32>
    %137 = arith.mulf %136, %135 : vector<8x128xf32>
    %138 = arith.mulf %137, %133 : vector<8x128xf32>
    %139 = arith.mulf %138, %127 : vector<8x128xf32>
    %140 = arith.mulf %139, %103 : vector<8x128xf32>
    %141 = arith.mulf %139, %110 : vector<8x128xf32>
    %142 = arith.mulf %139, %117 : vector<8x128xf32>
    %143 = math.absf %140 : vector<8x128xf32>
    %cst_43 = arith.constant 1.000000e+00 : f32
    %144 = vector.broadcast %cst_43 : f32 to vector<8x128xf32>
    %145 = arith.cmpf olt, %143, %144 : vector<8x128xf32>
    %cst_44 = arith.constant 5.000000e-01 : f32
    %146 = vector.broadcast %cst_44 : f32 to vector<8x128xf32>
    %147 = arith.mulf %146, %140 : vector<8x128xf32>
    %148 = arith.mulf %147, %140 : vector<8x128xf32>
    %cst_45 = arith.constant 5.000000e-01 : f32
    %149 = vector.broadcast %cst_45 : f32 to vector<8x128xf32>
    %150 = arith.subf %143, %149 : vector<8x128xf32>
    %151 = arith.select %145, %148, %150 : vector<8x128xi1>, vector<8x128xf32>
    %152 = math.absf %141 : vector<8x128xf32>
    %cst_46 = arith.constant 1.000000e+00 : f32
    %153 = vector.broadcast %cst_46 : f32 to vector<8x128xf32>
    %154 = arith.cmpf olt, %152, %153 : vector<8x128xf32>
    %cst_47 = arith.constant 5.000000e-01 : f32
    %155 = vector.broadcast %cst_47 : f32 to vector<8x128xf32>
    %156 = arith.mulf %155, %141 : vector<8x128xf32>
    %157 = arith.mulf %156, %141 : vector<8x128xf32>
    %cst_48 = arith.constant 5.000000e-01 : f32
    %158 = vector.broadcast %cst_48 : f32 to vector<8x128xf32>
    %159 = arith.subf %152, %158 : vector<8x128xf32>
    %160 = arith.select %154, %157, %159 : vector<8x128xi1>, vector<8x128xf32>
    %161 = arith.addf %151, %160 : vector<8x128xf32>
    %162 = math.absf %142 : vector<8x128xf32>
    %cst_49 = arith.constant 1.000000e+00 : f32
    %163 = vector.broadcast %cst_49 : f32 to vector<8x128xf32>
    %164 = arith.cmpf olt, %162, %163 : vector<8x128xf32>
    %cst_50 = arith.constant 5.000000e-01 : f32
    %165 = vector.broadcast %cst_50 : f32 to vector<8x128xf32>
    %166 = arith.mulf %165, %142 : vector<8x128xf32>
    %167 = arith.mulf %166, %142 : vector<8x128xf32>
    %cst_51 = arith.constant 5.000000e-01 : f32
    %168 = vector.broadcast %cst_51 : f32 to vector<8x128xf32>
    %169 = arith.subf %162, %168 : vector<8x128xf32>
    %170 = arith.select %164, %167, %169 : vector<8x128xi1>, vector<8x128xf32>
    %171 = arith.addf %161, %170 : vector<8x128xf32>
    %c0_i32 = arith.constant 0 : i32
    %172 = arith.cmpi eq, %arg0, %c0_i32 : i32
    %true = arith.constant true
    %173 = arith.xori %172, %true : i1
    %174 = arith.extui %173 : i1 to i32
    %c0_i32_52 = arith.constant 0 : i32
    %175 = arith.cmpi ne, %174, %c0_i32_52 : i32
    scf.if %175 {
      %cst_54 = arith.constant dense<0.000000e+00> : vector<128xf32>
      %178 = vector.multi_reduction <add>, %171, %cst_54 [0] : vector<8x128xf32> to vector<128xf32>
      %179 = vector.shape_cast %178 : vector<128xf32> to vector<1x128xf32>
      %c0_55 = arith.constant 0 : index
      %c0_56 = arith.constant 0 : index
      %180 = vector.load %arg5[%c0_55, %c0_56] : memref<1x128xf32, #tpu.memory_space<vmem>>, vector<1x128xf32>
      tpu.vector_store %arg5[%c0_55, %c0_56], %179 {strides = array<i32>} : memref<1x128xf32, #tpu.memory_space<vmem>>, vector<1x128xf32>,
    } else {
    }
    %176 = arith.extui %172 : i1 to i32
    %c0_i32_53 = arith.constant 0 : i32
    %177 = arith.cmpi ne, %176, %c0_i32_53 : i32
    scf.if %177 {
      %178 = tpu.iota {dimensions = array<i32: 0>} : vector<8x128xi32>
      %179 = tpu.iota {dimensions = array<i32: 1>} : vector<8x128xi32>
      %c1024_i32 = arith.constant 1024 : i32
      %180 = arith.muli %arg0, %c1024_i32 : i32
      %c8_i32 = arith.constant 8 : i32
      %181 = arith.subi %c8_i32, %180 : i32
      %c128_i32 = arith.constant 128 : i32
      %182 = vector.broadcast %c128_i32 : i32 to vector<8x128xi32>
      %183 = arith.muli %178, %182 : vector<8x128xi32>
      %184 = arith.addi %183, %179 : vector<8x128xi32>
      %185 = vector.broadcast %181 : i32 to vector<8x128xi32>
      %186 = arith.cmpi slt, %184, %185 : vector<8x128xi32>
      %cst_54 = arith.constant 0.000000e+00 : f32
      %187 = vector.broadcast %cst_54 : f32 to vector<8x128xf32>
      %188 = arith.select %186, %171, %187 : vector<8x128xi1>, vector<8x128xf32>
      %cst_55 = arith.constant dense<0.000000e+00> : vector<128xf32>
      %189 = vector.multi_reduction <add>, %188, %cst_55 [0] : vector<8x128xf32> to vector<128xf32>
      %190 = vector.shape_cast %189 : vector<128xf32> to vector<1x128xf32>
      %c0_56 = arith.constant 0 : index
      %c0_57 = arith.constant 0 : index
      %191 = vector.load %arg5[%c0_56, %c0_57] : memref<1x128xf32, #tpu.memory_space<vmem>>, vector<1x128xf32>
      tpu.vector_store %arg5[%c0_56, %c0_57], %190 {strides = array<i32>} : memref<1x128xf32, #tpu.memory_space<vmem>>, vector<1x128xf32>,
    } else {
    }
    return
  }
  func.func @transform_0(%arg0: i32) -> (i32, i32, i32) {
    %c0_i32 = arith.constant 0 : i32
    %c0_i32_0 = arith.constant 0 : i32
    %c0_i32_1 = arith.constant 0 : i32
    return %c0_i32, %arg0, %c0_i32_0 : i32, i32, i32
  }
  func.func @transform_1(%arg0: i32) -> (i32, i32, i32) {
    %c0_i32 = arith.constant 0 : i32
    %c0_i32_0 = arith.constant 0 : i32
    %c0_i32_1 = arith.constant 0 : i32
    return %c0_i32, %arg0, %c0_i32_0 : i32, i32, i32
  }
  func.func @transform_2(%arg0: i32) -> (i32, i32, i32) {
    %c0_i32 = arith.constant 0 : i32
    %c0_i32_0 = arith.constant 0 : i32
    %c0_i32_1 = arith.constant 0 : i32
    return %c0_i32, %arg0, %c0_i32_0 : i32, i32, i32
  }
  func.func @transform_3(%arg0: i32) -> (i32, i32, i32) {
    %c0_i32 = arith.constant 0 : i32
    %c0_i32_0 = arith.constant 0 : i32
    %c0_i32_1 = arith.constant 0 : i32
    return %c0_i32, %arg0, %c0_i32_0 : i32, i32, i32
  }
  func.func @transform_4(%arg0: i32) -> (i32, i32) {
    %c0_i32 = arith.constant 0 : i32
    %c0_i32_0 = arith.constant 0 : i32
    return %arg0, %c0_i32 : i32, i32
  }
}

</mosaic_0001>

<bundles_post_ra>
// kernel: tpu_custom_call.1
= control target key start
LH: loop header
LB: loop body
LE: loop exit
PB: predicated region body
PF: predicated region fallthrough
CT: control target
= control target key end

     0   :  { %9 = vsyncpa [#allocation3], 0  ;;  %s870_s0 = inlined_call_operand.hbm [shape: f32[4,8,128], index: 0, kind: input, shape index: {}]   ;;  %s871_s1 = inlined_call_operand.hbm [shape: f32[3,8,128], index: 1, kind: input, shape index: {}]   ;;  %s872_s2 = inlined_call_operand.hbm [shape: f32[3,8,128], index: 2, kind: input, shape index: {}]   ;;  %s873_s3 = inlined_call_operand.hbm [shape: f32[4,8,128], index: 3, kind: input, shape index: {}]   ;;  %s874_s4 = inlined_call_operand.hbm [shape: f32[1,128], index: 4, kind: output, shape index: {}]  }
   0x1   :  { %10 = vsyncpa [#allocation6], 0 }
   0x2   :  { %11 = vsyncpa [#allocation9], 0 }
   0x3   :  { %12 = vsyncpa [#allocation4], 0  ;;  %s689_s15 = smov [#allocation5]   ;;  %s690_s17 = smov [#allocation2]  }
   0x4   :  { %s30_s16 = sshll.u32 %s689_s15, 4  ;;  %s18_s18 = sshll.u32 %s690_s17, 4  ;;  %s31_s16 = int_to_ptr.vmem [resolvable:$true] %s30_s16  ;;  %s729_s18 = int_to_ptr.vmem [resolvable:$true] %s18_s18 }
   0x5   :  { %s571_s21 = scalar_lea.hbm %s871_s1, 384 }
   0x6   :  { %p572_p0 = scmp.ne.s32.totalorder %s871_s1, %s571_s21  ;;  %p575_p1 = scmp.lt.u32.totalorder %s571_s21, %s871_s1 }
   0x8   :  { %p577_p2 = pnand %p575_p1, %p572_p0 }
   0xa   :  { %580 = shalt.err (!%p577_p2)
}
   0xb   :  { %s581_s26 = scalar_lea.vmem %s31_s16, 384  ;;  %p586_p4 = scmp.lt.s32.totalorder %s31_s16, %s31_s16 }
   0xc   :  { %p582_p3 = scmp.ne.s32.totalorder %s31_s16, %s581_s26  ;;  %p587_p5 = scmp.lt.s32.totalorder %s581_s26, %s581_s26 }
   0xe   :  { %p588_p6 = por %p587_p5, %p586_p4 }
  0x10   :  { %p589_p7 = pnand %p588_p6, %p582_p3 }
  0x12   :  { %592 = shalt.err (!%p589_p7)
}
  0x13   :  { %s691_s27 = smov 128   ;;  %s692_s28 = smov 8  }
  0x14   :  { %36 = dma.hbm_to_vmem [thread:$0]  %s871_s1, 384, %s31_s16, [#allocation6], %s691_s27, %s691_s27, %s692_s28  }
  0x15   :  { %s593_s7 = scalar_lea.hbm %s870_s0, 512 }
  0x16   :  { %p594_p8 = scmp.ne.s32.totalorder %s870_s0, %s593_s7  ;;  %p597_p9 = scmp.lt.u32.totalorder %s593_s7, %s870_s0 }
  0x18   :  { %p599_p10 = pnand %p597_p9, %p594_p8 }
  0x1a   :  { %602 = shalt.err (!%p599_p10)
}
  0x1b   :  { %s603_s12 = scalar_lea.vmem %s729_s18, 512  ;;  %p608_p12 = scmp.lt.s32.totalorder %s729_s18, %s729_s18 }
  0x1c   :  { %p604_p11 = scmp.ne.s32.totalorder %s729_s18, %s603_s12  ;;  %p609_p13 = scmp.lt.s32.totalorder %s603_s12, %s603_s12 }
  0x1e   :  { %p610_p0 = por %p609_p13, %p608_p12 }
  0x20   :  { %p611_p1 = pnand %p610_p0, %p604_p11 }
  0x22   :  { %614 = shalt.err (!%p611_p1)
}
  0x23   :  { %24 = dma.hbm_to_vmem [thread:$0]  %s870_s0, 512, %s729_s18, [#allocation3], %s691_s27, %s691_s27, %s692_s28  }
  0x24   :  { %s693_s14 = smov [#allocation7]   ;;  %s694_s16 = smov [#allocation8]  }
  0x25   :  { %s42_s15 = sshll.u32 %s693_s14, 4  ;;  %s54_s17 = sshll.u32 %s694_s16, 4  ;;  %s43_s15 = int_to_ptr.vmem [resolvable:$true] %s42_s15  ;;  %s766_s17 = int_to_ptr.vmem [resolvable:$true] %s54_s17 }
  0x26   :  { %s615_s21 = scalar_lea.hbm %s872_s2, 384 }
  0x27   :  { %p616_p2 = scmp.ne.s32.totalorder %s872_s2, %s615_s21  ;;  %p619_p3 = scmp.lt.u32.totalorder %s615_s21, %s872_s2 }
  0x29   :  { %p621_p4 = pnand %p619_p3, %p616_p2 }
  0x2b   :  { %624 = shalt.err (!%p621_p4)
}
  0x2c   :  { %s625_s0 = scalar_lea.vmem %s43_s15, 384  ;;  %p630_p6 = scmp.lt.s32.totalorder %s43_s15, %s43_s15 }
  0x2d   :  { %p626_p5 = scmp.ne.s32.totalorder %s43_s15, %s625_s0  ;;  %p631_p7 = scmp.lt.s32.totalorder %s625_s0, %s625_s0 }
  0x2f   :  { %p632_p8 = por %p631_p7, %p630_p6 }
  0x31   :  { %p633_p9 = pnand %p632_p8, %p626_p5 }
  0x33   :  { %636 = shalt.err (!%p633_p9)
}
  0x34   :  { %48 = dma.hbm_to_vmem [thread:$0]  %s872_s2, 384, %s43_s15, [#allocation6], %s691_s27, %s691_s27, %s692_s28  }
  0x35   :  { %s637_s5 = scalar_lea.hbm %s873_s3, 512 }
  0x36   :  { %p638_p10 = scmp.ne.s32.totalorder %s873_s3, %s637_s5  ;;  %p641_p11 = scmp.lt.u32.totalorder %s637_s5, %s873_s3 }
  0x38   :  { %p643_p12 = pnand %p641_p11, %p638_p10 }
  0x3a   :  { %646 = shalt.err (!%p643_p12)
}
  0x3b   :  { %s647_s10 = scalar_lea.vmem %s766_s17, 512  ;;  %p652_p0 = scmp.lt.s32.totalorder %s766_s17, %s766_s17 }
  0x3c   :  { %p648_p13 = scmp.ne.s32.totalorder %s766_s17, %s647_s10  ;;  %p653_p1 = scmp.lt.s32.totalorder %s647_s10, %s647_s10 }
  0x3e   :  { %p654_p2 = por %p653_p1, %p652_p0 }
  0x40   :  { %p655_p3 = pnand %p654_p2, %p648_p13 }
  0x42   :  { %658 = shalt.err (!%p655_p3)
}
  0x43   :  { %60 = dma.hbm_to_vmem [thread:$0]  %s873_s3, 512, %s766_s17, [#allocation9], %s691_s27, %s691_s27, %s692_s28  }
  0x44   :  { %681 = dma.done.wait [#allocation3], 512  }
  0x45   :  { %682 = vsyncadd [#allocation3], 4294966784 }
  0x46   :  { %683 = dma.done.wait [#allocation6], 768  }
  0x47   :  { %684 = vsyncadd [#allocation6], 4294966528 }
  0x48   :  { %685 = dma.done.wait [#allocation9], 512  }
  0x49   :  { %686 = vsyncadd [#allocation9], 4294966784  ;;  %v73_v0 = vld [vmem:[#allocation5] sm:$0xff]  ;;  %v74_v1 = vld [vmem:[#allocation7] sm:$0xff]  ;;  %v695_v29 = vmov 683565275  }
  0x4a   :  { %v77_v2 = vld [vmem:[#allocation5 + $0x8] sm:$0xff]  ;;  %v803_v3 = vsub.f32 %v73_v0, %v74_v1  ;;  %v79_v4 = vld [vmem:[#allocation7 + $0x8] sm:$0xff]  ;;  %v82_v5 = vld [vmem:[#allocation5 + $0x10] sm:$0xff]  ;;  %v696_v31 = vmov 2475754826   ;;  %s703_s3 = smov [#allocation10]  }
  0x4b   :  { %v84_v6 = vld [vmem:[#allocation7 + $0x10] sm:$0xff]  ;;  %v805_v7 = vsub.f32 %v77_v2, %v79_v4  ;;  %v697_v33 = vmov 2131351028   ;;  %v698_v35 = vmov 2102212464   ;;  %s516_s27 = sshll.u32 %s703_s3, 4  ;;  %s517_s27 = int_to_ptr.vmem [resolvable:$true] %s516_s27 }
  0x4c   :  { %v807_v8 = vsub.f32 %v82_v5, %v84_v6  ;;  %v86_v9 = vmul.f32 %v803_v3, %v803_v3  ;;  %v699_v37 = vmov 920167782   ;;  %v700_v44 = vmov 1326507024   ;;  %s659_s28 = scalar_lea.vmem %s517_s27, 16  ;;  %s663_s12 = scalar_lea.vmem %s517_s27, 32 }
  0x4d   :  { %v87_v10 = vmul.f32 %v805_v7, %v805_v7  ;;  %p660_p4 = scmp.ne.s32.totalorder %s517_s27, %s659_s28  ;;  %p664_p5 = scmp.lt.s32.totalorder %s517_s27, %s517_s27 }
  0x4e   :  { %v89_v11 = vmul.f32 %v807_v8, %v807_v8  ;;  %p665_p6 = scmp.lt.s32.totalorder %s663_s12, %s659_s28 }
  0x4f   :  { %v88_v12 = vadd.f32 %v87_v10, %v86_v9 }
  0x50   :  { %p666_p7 = por %p665_p6, %p664_p5 }
  0x51   :  { %v90_v13 = vadd.f32 %v89_v11, %v88_v12 }
  0x52   :  { %p667_p8 = pnand %p666_p7, %p660_p4 }
  0x53   :  { %v91_v14 = vmax.f32 %v90_v13, 1e-30 }
  0x55   :  { %557 = vrsqrt.f32 %v91_v14 }
  0x5f   :  { %v815_v15 = vpop.eup %557 }
  0x60   :  { %v93_v16 = vmul.f32 %v815_v15, %v90_v13 }
  0x62   :  { %v818_v17 = vmul.f32 0.005, %v93_v16 }
  0x64   :  { %v98_v18 = vand.u32 2139095040, %v818_v17  ;;  %v95_v20 = vand.u32 2147483647, %v818_v17  ;;  %vm97_vm7 = vcmp.lt.s32.totalorder %v818_v17, 0  ;;  %vm187_vm15 = vweird.f32 %v818_v17 }
  0x66   :  { %v99_v19 = vshrl.u32 %v98_v18, 23  ;;  %v102_v23 = vand.u32 8388607, %v95_v20  ;;  %vm96_vm8 = vcmp.le.f32.partialorder %v95_v20, 0.7853982 }
  0x68   :  { %v527_v21 = vadd.s32 4294967169, %v99_v19  ;;  %v103_v26 = vor.u32 8388608, %v102_v23  ;;  %v306_v19 = vld [vmem:[#allocation2] sm:$0xff] }
  0x69   :  { %v313_v23 = vmul.f32 %v306_v19, %v306_v19 }
  0x6a   :  { %v105_v22 = vadd.s32 1, %v527_v21  ;;  %v143_v46 = vshll.u32 %v103_v26, 8  ;;  %v308_v21 = vld [vmem:[#allocation2 + $0x8] sm:$0xff]  ;;  %v310_v26 = vld [vmem:[#allocation2 + $0x10] sm:$0xff] }
  0x6c   :  { %vm106_vm0 = vcmp.gt.s32.totalorder %v105_v22, 0 }
  0x6d   :  { %v107_v24 = vsel %vm106_vm0, %v105_v22, 0 }
  0x6e   :  { %v109_v25 = vand.u32 31, %v107_v24  ;;  %v108_v27 = vshrl.u32 %v107_v24, 5  ;;  %v314_v24 = vmul.f32 %v308_v21, %v308_v21 }
  0x70   :  { %v110_v28 = vsub.s32 32, %v109_v25  ;;  %v112_v30 = vshll.u32 %v695_v29, %v109_v25  ;;  %v115_v32 = vshll.u32 %v696_v31, %v109_v25  ;;  %v118_v34 = vshll.u32 %v697_v33, %v109_v25 }
  0x71   :  { %v121_v36 = vshll.u32 %v698_v35, %v109_v25  ;;  %v124_v38 = vshll.u32 %v699_v37, %v109_v25  ;;  %vm127_vm1 = vcmp.lt.s32.totalorder %v108_v27, 1  ;;  %vm130_vm2 = vcmp.lt.s32.totalorder %v108_v27, 4 }
  0x72   :  { %v111_v39 = vshrl.u32 %v695_v29, %v110_v28  ;;  %v113_v40 = vshrl.u32 %v696_v31, %v110_v28  ;;  %v116_v41 = vshrl.u32 %v697_v33, %v110_v28  ;;  %v119_v42 = vshrl.u32 %v698_v35, %v110_v28 }
  0x73   :  { %v122_v43 = vshrl.u32 %v699_v37, %v110_v28  ;;  %v125_v45 = vshrl.u32 %v700_v44, %v110_v28  ;;  %vm128_vm3 = vcmp.lt.s32.totalorder %v108_v27, 2  ;;  %vm129_vm4 = vcmp.lt.s32.totalorder %v108_v27, 3 }
  0x74   :  { %v114_v47 = vor.u32 %v113_v40, %v112_v30  ;;  %v117_v48 = vor.u32 %v116_v41, %v115_v32  ;;  %v120_v49 = vor.u32 %v119_v42, %v118_v34  ;;  %v315_v29 = vadd.f32 %v314_v24, %v313_v23  ;;  %v312_v34 = vld [vmem:[#allocation2 + $0x18] sm:$0xff] }
  0x75   :  { %v123_v50 = vor.u32 %v122_v43, %v121_v36  ;;  %v126_v51 = vor.u32 %v125_v45, %v124_v38  ;;  %v316_v30 = vmul.f32 %v310_v26, %v310_v26  ;;  %v318_v38 = vmul.f32 %v312_v34, %v312_v34 }
  0x76   :  { %v131_v52 = vsel %vm127_vm1, %v111_v39, %v114_v47  ;;  %v132_v53 = vsel %vm130_vm2, %v120_v49, 2102212464  ;;  %v135_v54 = vsel %vm127_vm1, %v114_v47, %v117_v48  ;;  %v139_v55 = vsel %vm127_vm1, %v117_v48, %v120_v49 }
  0x77   :  { %v133_v56 = vsel %vm129_vm4, %v117_v48, %v132_v53  ;;  %v136_v57 = vsel %vm130_vm2, %v123_v50, 920167782  ;;  %v140_v58 = vsel %vm130_vm2, %v126_v51, 1326507024  ;;  %v317_v37 = vadd.f32 %v316_v30, %v315_v29 }
  0x78   :  { %v137_v59 = vsel %vm129_vm4, %v120_v49, %v136_v57  ;;  %v141_v60 = vsel %vm129_vm4, %v123_v50, %v140_v58  ;;  %v134_v61 = vsel %vm128_vm3, %v131_v52, %v133_v56 }
  0x79   :  { %v138_v62 = vsel %vm128_vm3, %v135_v54, %v137_v59  ;;  %v142_v63 = vsel %vm128_vm3, %v139_v55, %v141_v60  ;;  %v150_v5 = vmul.u32 %v143_v46, %v134_v61  ;;  %v319_v43 = vadd.f32 %v318_v38, %v317_v37  ;;  %v356_v37 = vld [vmem:[#allocation8 + $0x8] sm:$0xff] }
  0x7a   :  { %v824_v0 = vmul.u32.u64.low %v143_v46, %v142_v63  ;;  %v825_v1 = vmul.u32.u64.high %v143_v46, %v142_v63, %v824_v0  ;;  %v827_v2 = vmul.u32.u64.low %v143_v46, %v138_v62  ;;  %v828_v4 = vmul.u32.u64.high %v143_v46, %v138_v62, %v827_v2 }
  0x7b   :  { %v320_v47 = vmax.f32 %v319_v43, 1e-30  ;;  %v360_v43 = vld [vmem:[#allocation8 + $0x18] sm:$0xff] }
  0x7c   :  { %vm152_vm5 = vc.u32 %v825_v1, %v827_v2  ;;  %v153_v6 = vadd.s32 1, %v828_v4  ;;  %v151_v27 = vadd.s32 %v827_v2, %v825_v1 }
  0x7d   :  { %559 = vrsqrt.f32 %v320_v47 }
  0x7e   :  { %v154_v9 = vsel %vm152_vm5, %v153_v6, %v828_v4 }
  0x7f   :  { %v155_v10 = vadd.s32 %v154_v9, %v150_v5 }
  0x81   :  { %v156_v11 = vadd.s32 536870912, %v155_v10 }
  0x83   :  { %v157_v12 = vshrl.u32 %v156_v11, 30 }
  0x85   :  { %v158_v13 = vshll.u32 %v157_v12, 30  ;;  %v181_v45 = vsub.s32 4, %v157_v12 }
  0x87   :  { %v159_v14 = vsub.s32 %v155_v10, %v158_v13  ;;  %v182_v49 = vsel %vm97_vm7, %v181_v45, %v157_v12  ;;  %v560_v56 = vpop.eup %559 }
  0x88   :  { %v184_v52 = vsel %vm96_vm8, 0, %v182_v49  ;;  %v322_v0 = vmul.f32 %v560_v56, %v306_v19  ;;  %v323_v4 = vmul.f32 %v560_v56, %v308_v21  ;;  %v324_v10 = vmul.f32 %v560_v56, %v310_v26 }
  0x89   :  { %v161_v16 = vsub.s32 0, %v159_v14  ;;  %v291_v53 = vadd.s32 3, %v184_v52  ;;  %v188_v54 = vand.u32 3, %v184_v52  ;;  %v325_v11 = vmul.f32 %v560_v56, %v312_v34 }
  0x8b   :  { %v528_v18 = vmin.u32 %v161_v16, %v159_v14  ;;  %v292_v55 = vand.u32 3, %v291_v53  ;;  %vm193_vm9 = vcmp.eq.s32.totalorder %v188_v54, 2  ;;  %vm190_vm11 = vcmp.eq.s32.totalorder %v188_v54, 0 }
  0x8c   :  { %vm189_vm13 = vcmp.lt.s32.totalorder %v188_v54, 2 }
  0x8d   :  { %v163_v22 = vclz %v528_v18  ;;  %vm297_vm10 = vcmp.eq.s32.totalorder %v292_v55, 2  ;;  %vm294_vm12 = vcmp.eq.s32.totalorder %v292_v55, 0  ;;  %vm293_vm14 = vcmp.lt.s32.totalorder %v292_v55, 2 }
  0x8f   :  { %v529_v25 = vadd.s32 4294967294, %v163_v22 }
  0x91   :  { %vm530_vm6 = vcmp.lt.s32.totalorder %v529_v25, 0 }
  0x92   :  { %v166_v28 = vsel %vm530_vm6, 0, %v529_v25 }
  0x93   :  { %v167_v31 = vsub.s32 32, %v166_v28  ;;  %v168_v32 = vshll.u32 %v159_v14, %v166_v28  ;;  %v171_v33 = vsub.s32 4294967266, %v166_v28 }
  0x95   :  { %v169_v35 = vshrl.u32 %v151_v27, %v167_v31  ;;  %v172_v36 = vadd.s32 127, %v171_v33 }
  0x97   :  { %v170_v39 = vor.u32 %v169_v35, %v168_v32  ;;  %v173_v40 = vshll.u32 %v172_v36, 23  ;;  %v354_v36 = vld [vmem:[#allocation8] sm:$0xff] }
  0x99   :  { %v174_v41 = vor.u32 4788187, %v173_v40  ;;  %v177_v42 = vcvt.s32.f32 %v170_v39  ;;  %v358_v40 = vld [vmem:[#allocation8 + $0x10] sm:$0xff] }
  0x9b   :  { %v175_v44 = vand.u32 2147483647, %v174_v41 }
  0x9d   :  { %v178_v46 = vmul.f32 %v177_v42, %v175_v44 }
  0x9f   :  { %v179_v48 = vxor.u32 2147483648, %v178_v46 }
  0xa1   :  { %v180_v50 = vsel %vm97_vm7, %v179_v48, %v178_v46 }
  0xa2   :  { %v183_v51 = vsel %vm96_vm8, %v818_v17, %v180_v50 }
  0xa3   :  { %561 = vcosq.f32 %v183_v51 }
  0xa4   :  { %563 = vsinq.f32 %v183_v51 }
  0xad   :  { %v562_v57 = vpop.eup %561 }
  0xae   :  { %v564_v58 = vpop.eup %563  ;;  %v194_v59 = vxor.u32 2147483648, %v562_v57 }
  0xaf   :  { %v191_v20 = vxor.u32 2147483648, %v564_v58 }
  0xb0   :  { %v195_v60 = vsel %vm193_vm9, %v194_v59, %v564_v58  ;;  %v299_v61 = vsel %vm297_vm10, %v194_v59, %v564_v58 }
  0xb1   :  { %v192_v62 = vsel %vm190_vm11, %v562_v57, %v191_v20  ;;  %v296_v63 = vsel %vm294_vm12, %v562_v57, %v191_v20 }
  0xb2   :  { %v196_v1 = vsel %vm189_vm13, %v192_v62, %v195_v60  ;;  %v300_v2 = vsel %vm293_vm14, %v296_v63, %v299_v61 }
  0xb3   :  { %v197_v5 = vsel %vm187_vm15, nan, %v196_v1  ;;  %v301_v6 = vsel %vm187_vm15, nan, %v300_v2 }
  0xb4   :  { %v302_v9 = vmul.f32 %v815_v15, %v301_v6  ;;  %v326_v12 = vmul.f32 %v322_v0, %v197_v5  ;;  %v334_v16 = vmul.f32 %v323_v4, %v197_v5  ;;  %v343_v23 = vmul.f32 %v324_v10, %v197_v5 }
  0xb5   :  { %v352_v35 = vmul.f32 %v325_v11, %v197_v5 }
  0xb6   :  { %v303_v13 = vmul.f32 %v302_v9, %v803_v3  ;;  %v304_v14 = vmul.f32 %v302_v9, %v805_v7  ;;  %v305_v17 = vmul.f32 %v302_v9, %v807_v8 }
  0xb8   :  { %v327_v18 = vmul.f32 %v323_v4, %v303_v13  ;;  %v329_v22 = vmul.f32 %v324_v10, %v304_v14  ;;  %v333_v19 = vmul.f32 %v322_v0, %v303_v13  ;;  %v331_v24 = vmul.f32 %v325_v11, %v305_v17 }
  0xb9   :  { %v336_v21 = vmul.f32 %v324_v10, %v305_v17  ;;  %v340_v25 = vmul.f32 %v322_v0, %v304_v14  ;;  %v341_v27 = vmul.f32 %v323_v4, %v305_v17  ;;  %v338_v26 = vmul.f32 %v325_v11, %v304_v14 }
  0xba   :  { %v328_v28 = vsub.f32 %v326_v12, %v327_v18  ;;  %v335_v15 = vadd.f32 %v334_v16, %v333_v19  ;;  %v347_v29 = vmul.f32 %v322_v0, %v305_v17  ;;  %v345_v31 = vmul.f32 %v325_v11, %v303_v13 }
  0xbb   :  { %v342_v30 = vsub.f32 %v340_v25, %v341_v27  ;;  %v348_v3 = vmul.f32 %v323_v4, %v304_v14  ;;  %v350_v32 = vmul.f32 %v324_v10, %v303_v13 }
  0xbc   :  { %v330_v7 = vsub.f32 %v328_v28, %v329_v22  ;;  %v337_v33 = vadd.f32 %v336_v21, %v335_v15 }
  0xbd   :  { %v344_v8 = vadd.f32 %v343_v23, %v342_v30  ;;  %v349_v34 = vadd.f32 %v348_v3, %v347_v29 }
  0xbe   :  { %v332_v38 = vsub.f32 %v330_v7, %v331_v24  ;;  %v339_v39 = vsub.f32 %v337_v33, %v338_v26 }
  0xbf   :  { %v346_v41 = vadd.f32 %v345_v31, %v344_v8  ;;  %v351_v42 = vsub.f32 %v349_v34, %v350_v32 }
  0xc0   :  { %v361_v44 = vmul.f32 %v354_v36, %v332_v38  ;;  %v362_v45 = vmul.f32 %v356_v37, %v339_v39  ;;  %v368_v46 = vmul.f32 %v356_v37, %v332_v38  ;;  %v369_v47 = vmul.f32 %v354_v36, %v339_v39 }
  0xc1   :  { %v353_v48 = vadd.f32 %v352_v35, %v351_v42  ;;  %v364_v49 = vmul.f32 %v358_v40, %v346_v41  ;;  %v371_v50 = vmul.f32 %v360_v43, %v346_v41  ;;  %v375_v51 = vmul.f32 %v358_v40, %v332_v38 }
  0xc2   :  { %v363_v52 = vadd.f32 %v362_v45, %v361_v44  ;;  %v370_v53 = vsub.f32 %v368_v46, %v369_v47  ;;  %v376_v54 = vmul.f32 %v360_v43, %v339_v39  ;;  %v378_v55 = vmul.f32 %v354_v36, %v346_v41 }
  0xc3   :  { %v366_v56 = vmul.f32 %v360_v43, %v353_v48  ;;  %v373_v57 = vmul.f32 %v358_v40, %v353_v48  ;;  %v380_v58 = vmul.f32 %v356_v37, %v353_v48  ;;  %v382_v59 = vmul.f32 %v360_v43, %v332_v38 }
  0xc4   :  { %v365_v20 = vadd.f32 %v364_v49, %v363_v52  ;;  %v372_v60 = vsub.f32 %v370_v53, %v371_v50  ;;  %v377_v61 = vadd.f32 %v376_v54, %v375_v51  ;;  %v383_v62 = vmul.f32 %v358_v40, %v339_v39 }
  0xc5   :  { %v385_v63 = vmul.f32 %v356_v37, %v346_v41  ;;  %v387_v4 = vmul.f32 %v354_v36, %v353_v48  ;;  %v701_v51 = vmov 0.0   ;;  %v702_v54 = vmov 0.7853982  }
  0xc6   :  { %v843_v0 = vadd.f32 %v373_v57, %v372_v60  ;;  %v379_v1 = vsub.f32 %v377_v61, %v378_v55  ;;  %v384_v2 = vsub.f32 %v382_v59, %v383_v62  ;;  %v367_v5 = vadd.f32 %v366_v56, %v365_v20 }
  0xc7   :  { %v492_v60 = vlaneseq }
  0xc8   :  { %v845_v6 = vsub.f32 %v379_v1, %v380_v58  ;;  %v386_v9 = vadd.f32 %v385_v63, %v384_v2  ;;  %v389_v10 = vmul.f32 %v843_v0, %v843_v0  ;;  %v394_v17 = vmul.f32 %v367_v5, %v367_v5 }
  0xc9   :  { %v493_v63 = vshrl.u32 %v492_v60, 7 }
  0xca   :  { %v849_v11 = vsub.f32 %v386_v9, %v387_v4  ;;  %v390_v12 = vmul.f32 %v845_v6, %v845_v6  ;;  %v495_v4 = vand.u32 127, %v492_v60 }
  0xcc   :  { %v391_v13 = vadd.f32 %v390_v12, %v389_v10  ;;  %v392_v14 = vmul.f32 %v849_v11, %v849_v11 }
  0xce   :  { %v393_v16 = vadd.f32 %v392_v14, %v391_v13 }
  0xd0   :  { %v395_v18 = vadd.f32 %v394_v17, %v393_v16 }
  0xd2   :  { %v396_v22 = vmax.f32 %v395_v18, 1e-30 }
  0xd4   :  { %565 = vrsqrt.f32 %v396_v22 }
  0xde   :  { %v566_v19 = vpop.eup %565 }
  0xdf   :  { %v399_v23 = vmul.f32 %v566_v19, %v566_v19  ;;  %v398_v25 = vmul.f32 %v566_v19, %v367_v5  ;;  %v498_v5 = vmul.u32 128, %v493_v63 }
  0xe1   :  { %v400_v24 = vmul.f32 %v399_v23, %v393_v16  ;;  %v404_v15 = vand.u32 2147483647, %v398_v25  ;;  %vm434_vm1 = vcmp.lt.s32.totalorder %v398_v25, 0  ;;  %vm438_vm2 = vcmp.ne.f32.partialorder %v398_v25, %v398_v25 }
  0xe2   :  { %vm431_vm4 = vcmp.lt.f32.partialorder %v398_v25, 0.0  ;;  %v435_v52 = vsel %vm434_vm1, 3.1415927, %v701_v51  ;;  %v499_v23 = vadd.s32 %v498_v5, %v495_v4 }
  0xe3   :  { %v401_v21 = vmax.f32 %v400_v24, 1e-12  ;;  %vm444_vm5 = vcmp.eq.s32.totalorder %v404_v15, inf  ;;  %v443_v55 = vsel %vm431_vm4, 2.3561945, %v702_v54 }
  0xe4   :  { %vm501_vm13 = vcmp.lt.s32.totalorder %v499_v23, 8 }
  0xe5   :  { %567 = vrsqrt.f32 %v401_v21 }
  0xef   :  { %v568_v27 = vpop.eup %567 }
  0xf0   :  { %v403_v28 = vmul.f32 %v568_v27, %v401_v21 }
  0xf2   :  { %v405_v26 = vand.u32 2147483647, %v403_v28  ;;  %vm439_vm3 = vcmp.ne.f32.partialorder %v403_v28, %v403_v28  ;;  %vm436_vm7 = vcmp.eq.f32.partialorder %v403_v28, 0.0  ;;  %v449_v58 = vand.u32 2147483648, %v403_v28 }
  0xf3   :  { %vm440_vm8 = vmor %vm438_vm2, %vm439_vm3 }
  0xf4   :  { %v407_v29 = vmax.f32 %v404_v15, %v405_v26  ;;  %v406_v30 = vmin.f32 %v404_v15, %v405_v26  ;;  %vm428_vm0 = vcmp.gt.f32.partialorder %v405_v26, %v404_v15  ;;  %vm445_vm6 = vcmp.eq.s32.totalorder %v405_v26, inf }
  0xf5   :  { %vm446_vm9 = vmand %vm444_vm5, %vm445_vm6 }
  0xf6   :  { %569 = vrcp.f32 %v407_v29 }
 0x100   :  { %v570_v31 = vpop.eup %569 }
 0x101   :  { %v409_v3 = vmul.f32 %v570_v31, %v406_v30 }
 0x103   :  { %v410_v32 = vmul.f32 %v409_v3, %v409_v3 }
 0x105   :  { %v411_v7 = vmul.f32 0.002785687, %v410_v32 }
 0x107   :  { %v412_v33 = vadd.f32 -0.015866, %v411_v7 }
 0x109   :  { %v413_v8 = vmul.f32 %v412_v33, %v410_v32 }
 0x10b   :  { %v414_v34 = vadd.f32 0.04247222, %v413_v8 }
 0x10d   :  { %v415_v35 = vmul.f32 %v414_v34, %v410_v32 }
 0x10f   :  { %v416_v36 = vadd.f32 -0.074975304, %v415_v35 }
 0x111   :  { %v417_v37 = vmul.f32 %v416_v36, %v410_v32 }
 0x113   :  { %v418_v38 = vadd.f32 0.1064488, %v417_v37 }
 0x115   :  { %v419_v39 = vmul.f32 %v418_v38, %v410_v32 }
 0x117   :  { %v420_v40 = vadd.f32 -0.14207031, %v419_v39 }
 0x119   :  { %v421_v41 = vmul.f32 %v420_v40, %v410_v32 }
 0x11b   :  { %v422_v42 = vadd.f32 0.19993454, %v421_v41 }
 0x11d   :  { %v423_v43 = vmul.f32 %v422_v42, %v410_v32 }
 0x11f   :  { %v424_v44 = vadd.f32 -0.33333147, %v423_v43 }
 0x121   :  { %v425_v45 = vmul.f32 %v424_v44, %v410_v32 }
 0x123   :  { %v426_v46 = vmul.f32 %v425_v45, %v409_v3 }
 0x125   :  { %v427_v47 = vadd.f32 %v426_v46, %v409_v3 }
 0x127   :  { %v429_v48 = vsub.f32 1.5707964, %v427_v47 }
 0x129   :  { %v430_v49 = vsel %vm428_vm0, %v429_v48, %v427_v47 }
 0x12a   :  { %v432_v50 = vsub.f32 3.1415927, %v430_v49 }
 0x12c   :  { %v433_v53 = vsel %vm431_vm4, %v432_v50, %v430_v49 }
 0x12d   :  { %v437_v56 = vsel %vm436_vm7, %v435_v52, %v433_v53 }
 0x12e   :  { %v441_v57 = vsel %vm440_vm8, nan, %v437_v56 }
 0x12f   :  { %v447_v59 = vsel %vm446_vm9, %v443_v55, %v441_v57 }
 0x130   :  { %v448_v20 = vand.u32 2147483647, %v447_v59 }
 0x132   :  { %v450_v61 = vor.u32 %v449_v58, %v448_v20 }
 0x134   :  { %v451_v62 = vmul.f32 2.0, %v450_v61 }
 0x136   :  { %v452_v1 = vmul.f32 %v568_v27, %v451_v62 }
 0x138   :  { %v453_v2 = vmul.f32 %v566_v19, %v452_v1 }
 0x13a   :  { %v454_v9 = vmul.f32 %v453_v2, %v843_v0  ;;  %v455_v10 = vmul.f32 %v453_v2, %v845_v6  ;;  %v456_v12 = vmul.f32 %v453_v2, %v849_v11 }
 0x13c   :  { %v457_v13 = vand.u32 2147483647, %v454_v9  ;;  %v459_v14 = vmul.f32 0.5, %v454_v9  ;;  %v463_v17 = vand.u32 2147483647, %v455_v10  ;;  %v465_v16 = vmul.f32 0.5, %v455_v10 }
 0x13d   :  { %v470_v18 = vand.u32 2147483647, %v456_v12  ;;  %v472_v22 = vmul.f32 0.5, %v456_v12 }
 0x13e   :  { %vm458_vm10 = vcmp.lt.f32.partialorder %v457_v13, 1.0  ;;  %v460_v24 = vmul.f32 %v459_v14, %v454_v9  ;;  %v535_v21 = vadd.f32 -0.5, %v457_v13  ;;  %vm464_vm11 = vcmp.lt.f32.partialorder %v463_v17, 1.0 }
 0x13f   :  { %v466_v19 = vmul.f32 %v465_v16, %v455_v10  ;;  %v536_v25 = vadd.f32 -0.5, %v463_v17  ;;  %vm471_vm12 = vcmp.lt.f32.partialorder %v470_v18, 1.0  ;;  %v473_v27 = vmul.f32 %v472_v22, %v456_v12 }
 0x140   :  { %v462_v0 = vsel %vm458_vm10, %v460_v24, %v535_v21  ;;  %v537_v28 = vadd.f32 -0.5, %v470_v18 }
 0x141   :  { %v468_v6 = vsel %vm464_vm11, %v466_v19, %v536_v25 }
 0x142   :  { %v469_v15 = vadd.f32 %v468_v6, %v462_v0  ;;  %v475_v11 = vsel %vm471_vm12, %v473_v27, %v537_v28 }
 0x144   :  { %v476_v26 = vadd.f32 %v475_v11, %v469_v15 }
 0x146   :  { %v502_v29 = vsel %vm501_vm13, %v476_v26, 0.0 }
 0x147   :  { %v503_v30 = vrot.slane %v502_v29, 4 }
 0x149   :  { %v504_v31 = vadd.f32 %v503_v30, %v502_v29 }
 0x14b   :  { %v505_v3 = vrot.slane %v504_v31, 2 }
 0x14d   :  { %v506_v32 = vadd.f32 %v505_v3, %v504_v31 }
 0x14f   :  { %v507_v7 = vrot.slane %v506_v32, 1 }
 0x151   :  { %v508_v33 = vadd.f32 %v507_v7, %v506_v32 }
 0x153   :  { %509 = vst [vmem:[#allocation10] sm:$0x1] %v508_v33 }
 0x154   :  { %670 = shalt.err (!%p667_p8)
}
 0x155   :  { %s671_s14 = scalar_lea.hbm %s874_s4, 16 }
 0x156   :  { %p672_p9 = scmp.ne.s32.totalorder %s874_s4, %s671_s14  ;;  %p675_p10 = scmp.lt.u32.totalorder %s671_s14, %s874_s4 }
 0x158   :  { %p677_p11 = pnand %p675_p10, %p672_p9 }
 0x15a   :  { %680 = shalt.err (!%p677_p11)
}
 0x15b   :  { %519 = dma.vmem_to_hbm [thread:$0]  %s517_s27, 16, %s874_s4, [#allocation4]  }
 0x15c   :  { %687 = dma.done.wait [#allocation4], 16  }
 0x15d   :  { %688 = vsyncadd [#allocation4], 4294967280 }
 0x15e   :  { %523 = vsyncpa [#allocation3], 1 }
 0x15f   :  { %524 = vsyncpa [#allocation6], 1 }
 0x160   :  { %525 = vsyncpa [#allocation9], 1 }
 0x161   :  { %526 = vsyncpa [#allocation4], 1 }

</bundles_post_ra>
